<compile_context>
chip_gen: v6e
topology: v6e:2x2x1
jax: 0.10.0
libtpu: 0.0.40
codegen_flags: <defaults>
</compile_context>

<pallas_src>
import functools
from math import sqrt

import jax
import jax.numpy as jnp
from jax.experimental import pallas as pl
from jax.experimental.pallas import tpu as pltpu

H1, H2, OUT = 64, 32, 1


def mlp_kernel(x_ref, w1_ref, b1_ref, w2_ref, b2_ref, w3_ref, b3_ref, o_ref):
    # x tile arrives row-major f32 straight from HBM; cast to bf16 on the VPU
    # and feed the MXU with the batch on the lane axis (trans_b form), so every
    # matmul has a wide lane-dense N and the (1, TB) output store is unmasked.
    xb = x_ref[...].astype(jnp.bfloat16)                                   # (TB, D)  bf16
    h1 = jnp.dot(w1_ref[...], xb.T, preferred_element_type=jnp.float32)    # (64, TB) f32 acc
    h1 = jnp.maximum(h1 + b1_ref[...], 0.0).astype(jnp.bfloat16)           # bias+ReLU in f32
    h2 = jnp.dot(w2_ref[...], h1, preferred_element_type=jnp.float32)      # (32, TB)
    h2 = jnp.maximum(h2 + b2_ref[...], 0.0).astype(jnp.bfloat16)
    out = jnp.dot(w3_ref[...], h2, preferred_element_type=jnp.float32)     # (1,  TB)
    o_ref[...] = (out + b3_ref[...]).astype(o_ref.dtype)


@functools.partial(jax.jit, static_argnames=("block_b",))
def mlp_forward(x, w1, b1, w2, b2, w3, b3, *, block_b=4096):
    """x: (B, D) float32. Weights in PyTorch (out, in) layout, biases (out, 1)."""
    assert block_b % 128 == 0, "batch tile must be a multiple of the 128-lane width"
    B, D = x.shape
    # Clamp the tile to the (128-rounded) batch so tiny batches don't waste a
    # giant tile; large batches use the full block_b.
    TB = min(block_b, ((B + 127) // 128) * 128)
    n_blocks = pl.cdiv(B, TB)

    # Weights are tiny; cast them once in the wrapper. x is NOT touched here.
    w1b = w1.astype(jnp.bfloat16)
    w2b = w2.astype(jnp.bfloat16)
    w3b = w3.astype(jnp.bfloat16)

    def resident(shape):  # same block every grid step -> stays in VMEM
        return pl.BlockSpec(shape, lambda i: (0, 0))

    flops = 2 * B * (D * H1 + H1 * H2 + H2 * OUT)
    bytes_accessed = (
        x.size * 4 + B * OUT * 4
        + (w1b.size + w2b.size + w3b.size) * 2
        + (b1.size + b2.size + b3.size) * 4
    )

    outT = pl.pallas_call(
        mlp_kernel,
        out_shape=jax.ShapeDtypeStruct((OUT, B), jnp.float32),
        grid=(n_blocks,),
        in_specs=[
            pl.BlockSpec((TB, D), lambda i: (i, 0)),     # stream raw f32 x tiles
            resident(w1b.shape), resident(b1.shape),
            resident(w2b.shape), resident(b2.shape),
            resident(w3b.shape), resident(b3.shape),
        ],
        out_specs=pl.BlockSpec((OUT, TB), lambda i: (0, i)),
        compiler_params=pltpu.CompilerParams(
            dimension_semantics=("parallel",),           # megacore sharding on v7x
            vmem_limit_bytes=48 * 1024 * 1024,           # headroom for TB sweeps, safe on all gens
        ),
        cost_estimate=pl.CostEstimate(
            flops=flops, transcendentals=0, bytes_accessed=bytes_accessed),
    )(x, w1b, b1, w2b, b2, w3b, b3)

    return outT.T                                        # (B, 1) float32


def init_params(key, input_dim):
    """PyTorch-style U(-1/sqrt(fan_in), 1/sqrt(fan_in)) init.

    Weights in PyTorch (out, in) layout; biases as (out, 1) columns so they
    broadcast over the lane (batch) axis inside the kernel.
    """
    dims = [(H1, input_dim), (H2, H1), (OUT, H2)]
    params = []
    for (fan_out, fan_in) in dims:
        key, kw, kb = jax.random.split(key, 3)
        bound = 1.0 / sqrt(fan_in)
        w = jax.random.uniform(kw, (fan_out, fan_in), jnp.float32, -bound, bound)
        b = jax.random.uniform(kb, (fan_out, 1), jnp.float32, -bound, bound)
        params.extend([w, b])
    return params


def mlp_reference(x, w1, b1, w2, b2, w3, b3):
    """Pure-JAX reference matching the kernel's bf16-operand / f32-accum math."""
    xb = x.astype(jnp.bfloat16)
    w1b, w2b, w3b = (w1.astype(jnp.bfloat16), w2.astype(jnp.bfloat16),
                     w3.astype(jnp.bfloat16))
    h1 = jnp.maximum(
        jnp.dot(xb, w1b.T, preferred_element_type=jnp.float32) + b1[:, 0], 0.0
    ).astype(jnp.bfloat16)
    h2 = jnp.maximum(
        jnp.dot(h1, w2b.T, preferred_element_type=jnp.float32) + b2[:, 0], 0.0
    ).astype(jnp.bfloat16)
    return jnp.dot(h2, w3b.T, preferred_element_type=jnp.float32) + b3[:, 0]


if __name__ == "__main__":
    key = jax.random.PRNGKey(0)
    key, kx = jax.random.split(key)

    # small shapes; batch deliberately not a multiple of 128 to exercise the
    # partial tail block (no padding in the wrapper).
    batch, input_dim = 200, 16
    x = jax.random.normal(kx, (batch, input_dim), jnp.float32)
    params = init_params(key, input_dim)

    ref = mlp_reference(x, *params)

    # Default tile (clamped to 256 here): single grid step with ragged tail.
    out_big = jax.block_until_ready(mlp_forward(x, *params))
    assert out_big.shape == (batch, 1)
    assert jnp.allclose(out_big, ref, atol=1e-2, rtol=1e-2), "mismatch (default tile)"

    # Small tile: multi-step grid (2 blocks) + ragged tail.
    out_small = jax.block_until_ready(mlp_forward(x, *params, block_b=128))
    assert out_small.shape == (batch, 1)
    assert jnp.allclose(out_small, ref, atol=1e-2, rtol=1e-2), "mismatch (block_b=128)"

    print("KERNEL_OK")
</pallas_src>

<mosaic_0001>
module attributes {stable_mosaic.version = 11 : i64} {
  func.func @mlp_kernel(%arg0: i32, %arg1: memref<256x16xf32, #tpu.memory_space<vmem>>, %arg2: memref<64x16xbf16, #tpu.memory_space<vmem>>, %arg3: memref<64x1xf32, #tpu.memory_space<vmem>>, %arg4: memref<32x64xbf16, #tpu.memory_space<vmem>>, %arg5: memref<32x1xf32, #tpu.memory_space<vmem>>, %arg6: memref<1x32xbf16, #tpu.memory_space<vmem>>, %arg7: memref<1x1xf32, #tpu.memory_space<vmem>>, %arg8: memref<1x256xf32, #tpu.memory_space<vmem>>) attributes {dimension_semantics = [#tpu.dimension_semantics<parallel>], iteration_bounds = array<i64: 1>, scalar_prefetch = 0 : i64, scratch_operands = 0 : i64, tpu.core_type = #tpu.core_type<tc>, window_params = [{transform_indices = @transform_0, window_bounds = array<i64: 256, 16>}, {pipeline_mode = #tpu.pipeline_mode<synchronous>, transform_indices = @transform_1, window_bounds = array<i64: 64, 16>}, {pipeline_mode = #tpu.pipeline_mode<synchronous>, transform_indices = @transform_2, window_bounds = array<i64: 64, 1>}, {pipeline_mode = #tpu.pipeline_mode<synchronous>, transform_indices = @transform_3, window_bounds = array<i64: 32, 64>}, {pipeline_mode = #tpu.pipeline_mode<synchronous>, transform_indices = @transform_4, window_bounds = array<i64: 32, 1>}, {pipeline_mode = #tpu.pipeline_mode<synchronous>, transform_indices = @transform_5, window_bounds = array<i64: 1, 32>}, {pipeline_mode = #tpu.pipeline_mode<synchronous>, transform_indices = @transform_6, window_bounds = array<i64: 1, 1>}, {transform_indices = @transform_7, window_bounds = array<i64: 1, 256>}]} {
    %c0 = arith.constant 0 : index
    %c0_0 = arith.constant 0 : index
    %0 = vector.load %arg1[%c0, %c0_0] : memref<256x16xf32, #tpu.memory_space<vmem>>, vector<256x16xf32>
    %1 = arith.truncf %0 : vector<256x16xf32> to vector<256x16xbf16>
    %c0_1 = arith.constant 0 : index
    %c0_2 = arith.constant 0 : index
    %2 = vector.load %arg2[%c0_1, %c0_2] : memref<64x16xbf16, #tpu.memory_space<vmem>>, vector<64x16xbf16>
    %3 = tpu.transpose %1, [1, 0] : vector<256x16xbf16> -> vector<16x256xbf16>
    %cst = arith.constant dense<0.000000e+00> : vector<64x256xf32>
    %4 = tpu.matmul %2, %3, %cst {dimension_numbers = #tpu.dot_dimension_numbers<[1], [0], [0], [1], [0, 0, 1, 1], [], []>} : vector<64x16xbf16>, vector<16x256xbf16>, vector<64x256xf32> -> vector<64x256xf32>
    %c0_3 = arith.constant 0 : index
    %c0_4 = arith.constant 0 : index
    %5 = vector.load %arg3[%c0_3, %c0_4] : memref<64x1xf32, #tpu.memory_space<vmem>>, vector<64x1xf32>
    %6 = vector.broadcast %5 : vector<64x1xf32> to vector<64x256xf32>
    %7 = arith.addf %4, %6 : vector<64x256xf32>
    %cst_5 = arith.constant 0.000000e+00 : f32
    %8 = vector.broadcast %cst_5 : f32 to vector<64x256xf32>
    %9 = arith.maximumf %7, %8 : vector<64x256xf32>
    %10 = arith.truncf %9 : vector<64x256xf32> to vector<64x256xbf16>
    %c0_6 = arith.constant 0 : index
    %c0_7 = arith.constant 0 : index
    %11 = vector.load %arg4[%c0_6, %c0_7] : memref<32x64xbf16, #tpu.memory_space<vmem>>, vector<32x64xbf16>
    %cst_8 = arith.constant dense<0.000000e+00> : vector<32x256xf32>
    %12 = tpu.matmul %11, %10, %cst_8 {dimension_numbers = #tpu.dot_dimension_numbers<[1], [0], [0], [1], [0, 0, 1, 1], [], []>} : vector<32x64xbf16>, vector<64x256xbf16>, vector<32x256xf32> -> vector<32x256xf32>
    %c0_9 = arith.constant 0 : index
    %c0_10 = arith.constant 0 : index
    %13 = vector.load %arg5[%c0_9, %c0_10] : memref<32x1xf32, #tpu.memory_space<vmem>>, vector<32x1xf32>
    %14 = vector.broadcast %13 : vector<32x1xf32> to vector<32x256xf32>
    %15 = arith.addf %12, %14 : vector<32x256xf32>
    %cst_11 = arith.constant 0.000000e+00 : f32
    %16 = vector.broadcast %cst_11 : f32 to vector<32x256xf32>
    %17 = arith.maximumf %15, %16 : vector<32x256xf32>
    %18 = arith.truncf %17 : vector<32x256xf32> to vector<32x256xbf16>
    %c0_12 = arith.constant 0 : index
    %c0_13 = arith.constant 0 : index
    %19 = vector.load %arg6[%c0_12, %c0_13] : memref<1x32xbf16, #tpu.memory_space<vmem>>, vector<1x32xbf16>
    %cst_14 = arith.constant dense<0.000000e+00> : vector<1x256xf32>
    %20 = tpu.matmul %19, %18, %cst_14 {dimension_numbers = #tpu.dot_dimension_numbers<[1], [0], [0], [1], [0, 0, 1, 1], [], []>} : vector<1x32xbf16>, vector<32x256xbf16>, vector<1x256xf32> -> vector<1x256xf32>
    %c0_15 = arith.constant 0 : index
    %c0_16 = arith.constant 0 : index
    %21 = vector.load %arg7[%c0_15, %c0_16] : memref<1x1xf32, #tpu.memory_space<vmem>>, vector<1x1xf32>
    %22 = vector.broadcast %21 : vector<1x1xf32> to vector<1x256xf32>
    %23 = arith.addf %20, %22 : vector<1x256xf32>
    %c0_17 = arith.constant 0 : index
    %c0_18 = arith.constant 0 : index
    %24 = vector.load %arg8[%c0_17, %c0_18] : memref<1x256xf32, #tpu.memory_space<vmem>>, vector<1x256xf32>
    tpu.vector_store %arg8[%c0_17, %c0_18], %23 {strides = array<i32>} : memref<1x256xf32, #tpu.memory_space<vmem>>, vector<1x256xf32>,
    return
  }
  func.func @transform_0(%arg0: i32) -> (i32, i32) {
    %c0_i32 = arith.constant 0 : i32
    %c0_i32_0 = arith.constant 0 : i32
    return %arg0, %c0_i32 : i32, i32
  }
  func.func @transform_1(%arg0: i32) -> (i32, i32) {
    %c0_i32 = arith.constant 0 : i32
    %c0_i32_0 = arith.constant 0 : i32
    %c0_i32_1 = arith.constant 0 : i32
    return %c0_i32, %c0_i32_0 : i32, i32
  }
  func.func @transform_2(%arg0: i32) -> (i32, i32) {
    %c0_i32 = arith.constant 0 : i32
    %c0_i32_0 = arith.constant 0 : i32
    %c0_i32_1 = arith.constant 0 : i32
    return %c0_i32, %c0_i32_0 : i32, i32
  }
  func.func @transform_3(%arg0: i32) -> (i32, i32) {
    %c0_i32 = arith.constant 0 : i32
    %c0_i32_0 = arith.constant 0 : i32
    %c0_i32_1 = arith.constant 0 : i32
    return %c0_i32, %c0_i32_0 : i32, i32
  }
  func.func @transform_4(%arg0: i32) -> (i32, i32) {
    %c0_i32 = arith.constant 0 : i32
    %c0_i32_0 = arith.constant 0 : i32
    %c0_i32_1 = arith.constant 0 : i32
    return %c0_i32, %c0_i32_0 : i32, i32
  }
  func.func @transform_5(%arg0: i32) -> (i32, i32) {
    %c0_i32 = arith.constant 0 : i32
    %c0_i32_0 = arith.constant 0 : i32
    %c0_i32_1 = arith.constant 0 : i32
    return %c0_i32, %c0_i32_0 : i32, i32
  }
  func.func @transform_6(%arg0: i32) -> (i32, i32) {
    %c0_i32 = arith.constant 0 : i32
    %c0_i32_0 = arith.constant 0 : i32
    %c0_i32_1 = arith.constant 0 : i32
    return %c0_i32, %c0_i32_0 : i32, i32
  }
  func.func @transform_7(%arg0: i32) -> (i32, i32) {
    %c0_i32 = arith.constant 0 : i32
    %c0_i32_0 = arith.constant 0 : i32
    return %c0_i32, %arg0 : i32, i32
  }
}

</mosaic_0001>

<bundles_post_ra>
// kernel: mlp_forward.1
= control target key start
LH: loop header
LB: loop body
LE: loop exit
PB: predicated region body
PF: predicated region fallthrough
CT: control target
= control target key end

     0   :  { %s828_s0 = inlined_call_operand.vmem [shape: f32[200,16], index: 0, kind: input, shape index: {}]   ;;  %s829_s1 = inlined_call_operand.vmem [shape: bf16[64,16], index: 1, kind: input, shape index: {}]   ;;  %s830_s2 = inlined_call_operand.vmem [shape: f32[64,1], index: 2, kind: input, shape index: {}]   ;;  %s831_s3 = inlined_call_operand.vmem [shape: bf16[32,64], index: 3, kind: input, shape index: {}]   ;;  %s832_s4 = inlined_call_operand.vmem [shape: f32[32,1], index: 4, kind: input, shape index: {}]   ;;  %s833_s5 = inlined_call_operand.vmem [shape: bf16[1,32], index: 5, kind: input, shape index: {}]   ;;  %s834_s6 = inlined_call_operand.<no memory space> [shape: f32[1,1], index: 6, kind: input, shape index: {}]   ;;  %s835_s7 = inlined_call_operand.hbm [shape: f32[1,200], index: 7, kind: output, shape index: {}]  }
   0x1   :  { %v12_v0 = vstv %s834_s6 }
   0x2   :  { %13 = vst [vmem:[#allocation2] sm:$0x1] %v12_v0 }
   0x3   :  { %v60_v1 = vld [vmem:[%s828_s0 + $0xf0] sm:$0xff]  ;;  %v61_v2 = vld [vmem:[%s828_s0 + $0xf8] sm:$0xff]  ;;  %vm154_vm0 = vcmask 130048   ;;  %v58_v6 = vld [vmem:[%s828_s0 + $0xe0] sm:$0xff]  ;;  %v593_v8 = vmov 0  }
   0x4   :  { %v44_v3 = vld [vmem:[%s828_s0 + $0x70] sm:$0xff]  ;;  %v77_v4 = vpack.c.bf16 %v61_v2, %v60_v1  ;;  %v45_v5 = vld [vmem:[%s828_s0 + $0x78] sm:$0xff]  ;;  %v59_v7 = vld [vmem:[%s828_s0 + $0xe8] sm:$0xff]  ;;  %563 = vset.pattern.permute.xlu0 %v593_v8  ;;  %564 = vset.pattern.permute.xlu1 %v593_v8 }
   0x5   :  { %v69_v9 = vpack.c.bf16 %v45_v5, %v44_v3  ;;  %v76_v10 = vpack.c.bf16 %v59_v7, %v58_v6  ;;  %389 = vmatprep.mubr.bf16.mxu1 %v593_v8  ;;  %v42_v11 = vld [vmem:[%s828_s0 + $0x60] sm:$0xff]  ;;  %v43_v12 = vld [vmem:[%s828_s0 + $0x68] sm:$0xff]  ;;  %v56_v15 = vld [vmem:[%s828_s0 + $0xd0] sm:$0xff] }
   0x6   :  { %552 = vmatprep.subr.msk.bf16.mxu0 %vm154_vm0, %v77_v4  ;;  %v68_v14 = vpack.c.bf16 %v43_v12, %v42_v11  ;;  %v57_v16 = vld [vmem:[%s828_s0 + $0xd8] sm:$0xff]  ;;  %v40_v19 = vld [vmem:[%s828_s0 + $0x50] sm:$0xff]  ;;  %v685_v21 = vld [vmem:[%s829_s1] sm:$0xff]  }
   0x7   :  { %v189_v13 = vsel %vm154_vm0, %v69_v9, 0  ;;  %v75_v18 = vpack.c.bf16 %v57_v16, %v56_v15  ;;  %v41_v20 = vld [vmem:[%s828_s0 + $0x58] sm:$0xff]  ;;  %544 = vmatprep.mubr.msk.bf16.mxu0 %vm154_vm0, %v685_v21  ;;  %v92_v23 = vld [vmem:[%s830_s2 + $0x30] sm:$0xff]  ;;  %v54_v24 = vld [vmem:[%s828_s0 + $0xc0] sm:$0xff] }
   0x8   :  { %529 = vmatpush3.bf16.xpose.msra.mxu0 %v189_v13  ;;  %v186_v17 = vsel %vm154_vm0, %v68_v14, 0  ;;  %v67_v22 = vpack.c.bf16 %v41_v20, %v40_v19  ;;  %v55_v25 = vld [vmem:[%s828_s0 + $0xc8] sm:$0xff]  ;;  %126 = vperm.xlu0 %563, %v92_v23   ;;  %v90_v26 = vld [vmem:[%s830_s2 + $0x20] sm:$0xff]  ;;  %v93_v27 = vld [vmem:[%s830_s2 + $0x38] sm:$0xff] }
   0x9   :  { %553 = vmatprep.subr.msk.bf16.mxu0 %vm154_vm0, %v76_v10  ;;  %116 = vperm.xlu1 %564, %v90_v26   ;;  %v91_v28 = vld [vmem:[%s830_s2 + $0x28] sm:$0xff]  ;;  %v74_v30 = vpack.c.bf16 %v55_v25, %v54_v24  ;;  %v38_v31 = vld [vmem:[%s828_s0 + $0x40] sm:$0xff]  ;;  %v88_v33 = vld [vmem:[%s830_s2 + $0x10] sm:$0xff] }
   0xa   :  { %v183_v29 = vsel %vm154_vm0, %v67_v22, 0  ;;  %v39_v32 = vld [vmem:[%s828_s0 + $0x48] sm:$0xff] }
   0xc   :  { %131 = vperm.xlu0 %563, %v93_v27  }
   0xd   :  { %121 = vperm.xlu1 %564, %v91_v28  }
  0x10   :  { %531 = vmatpush3.bf16.xpose.msra.mxu0 %v186_v17 }
  0x11   :  { %554 = vmatprep.subr.msk.bf16.mxu0 %vm154_vm0, %v75_v18 }
  0x12   :  { %14 = vsyncpa [#allocation4], 0  ;;  %v89_v34 = vld [vmem:[%s830_s2 + $0x18] sm:$0xff]  ;;  %v66_v35 = vpack.c.bf16 %v39_v32, %v38_v31  ;;  %v52_v36 = vld [vmem:[%s828_s0 + $0xb0] sm:$0xff]  ;;  %106 = vperm.xlu0 %563, %v88_v33   ;;  %vm350_vm1 = vcmask 523264   ;;  %vm433_vm2 = vcmask 261120  }
  0x13   :  { %v53_v37 = vld [vmem:[%s828_s0 + $0xb8] sm:$0xff]  ;;  %111 = vperm.xlu1 %564, %v89_v34   ;;  %v86_v38 = vld [vmem:[%s830_s2] sm:$0xff]  ;;  %v87_v39 = vld [vmem:[%s830_s2 + $0x8] sm:$0xff]  ;;  %s595_s26 = smov [#allocation3]  }
  0x14   :  { %v180_v40 = vsel %vm154_vm0, %v66_v35, 0  ;;  %v73_v41 = vpack.c.bf16 %v53_v37, %v52_v36  ;;  %v36_v42 = vld [vmem:[%s828_s0 + $0x30] sm:$0xff]  ;;  %v37_v43 = vld [vmem:[%s828_s0 + $0x38] sm:$0xff]  ;;  %v50_v47 = vld [vmem:[%s828_s0 + $0xa0] sm:$0xff] }
  0x15   :  { %v318_v44 = vld [vmem:[%s832_s4 + $0x10] sm:$0xff]  ;;  %v319_v45 = vld [vmem:[%s832_s4 + $0x18] sm:$0xff]  ;;  %v65_v46 = vpack.c.bf16 %v37_v43, %v36_v42  ;;  %v51_v48 = vld [vmem:[%s828_s0 + $0xa8] sm:$0xff] }
  0x16   :  { %96 = vperm.xlu0 %563, %v86_v38   ;;  %v316_v49 = vld [vmem:[%s832_s4] sm:$0xff]  ;;  %v317_v50 = vld [vmem:[%s832_s4 + $0x8] sm:$0xff]  ;;  %v72_v52 = vpack.c.bf16 %v51_v48, %v50_v47  ;;  %v48_v57 = vld [vmem:[%s828_s0 + $0x90] sm:$0xff] }
  0x17   :  { %101 = vperm.xlu1 %564, %v87_v39   ;;  %v177_v51 = vsel %vm154_vm0, %v65_v46, 0  ;;  %v34_v53 = vld [vmem:[%s828_s0 + $0x20] sm:$0xff]  ;;  %v35_v54 = vld [vmem:[%s828_s0 + $0x28] sm:$0xff]  ;;  %v49_v58 = vld [vmem:[%s828_s0 + $0x98] sm:$0xff] }
  0x18   :  { %533 = vmatpush3.bf16.xpose.msra.mxu0 %v183_v29  ;;  %v423_v55 = vld [vmem:[#allocation2] sm:$0x1]  ;;  %v64_v56 = vpack.c.bf16 %v35_v54, %v34_v53  ;;  %v71_v60 = vpack.c.bf16 %v49_v58, %v48_v57  ;;  %v32_v61 = vld [vmem:[%s828_s0 + $0x10] sm:$0xff]  ;;  %v33_v62 = vld [vmem:[%s828_s0 + $0x18] sm:$0xff] }
  0x19   :  { %555 = vmatprep.subr.msk.bf16.mxu0 %vm154_vm0, %v74_v30  ;;  %v63_v63 = vpack.c.bf16 %v33_v62, %v32_v61  ;;  %v46_v0 = vld [vmem:[%s828_s0 + $0x80] sm:$0xff]  ;;  %v47_v1 = vld [vmem:[%s828_s0 + $0x88] sm:$0xff]  ;;  %v567_v10 = vld [vmem:[%s829_s1 + $0x10] sm:$0xff]  }
  0x1a   :  { %332 = vperm.xlu0 %563, %v318_v44   ;;  %v174_v59 = vsel %vm154_vm0, %v64_v56, 0  ;;  %v70_v3 = vpack.c.bf16 %v47_v1, %v46_v0  ;;  %v30_v4 = vld [vmem:[%s828_s0] sm:$0xff]  ;;  %v31_v5 = vld [vmem:[%s828_s0 + $0x8] sm:$0xff]  ;;  %v568_v11 = vld [vmem:[%s829_s1 + $0x18] sm:$0xff]  }
  0x1b   :  { %337 = vperm.xlu1 %564, %v319_v45   ;;  %v171_v2 = vsel %vm154_vm0, %v63_v63, 0  ;;  %v62_v6 = vpack.c.bf16 %v31_v5, %v30_v4  ;;  %v566_v9 = vld [vmem:[%s829_s1 + $0x8] sm:$0xff]  }
  0x1d   :  { %v168_v7 = vsel %vm154_vm0, %v62_v6, 0 }
  0x1e   :  { %322 = vperm.xlu0 %563, %v316_v49  }
  0x1f   :  { %327 = vperm.xlu1 %564, %v317_v50  }
  0x20   :  { %535 = vmatpush3.bf16.xpose.msra.mxu0 %v180_v40 }
  0x21   :  { %556 = vmatprep.subr.msk.bf16.mxu0 %vm154_vm0, %v73_v41 }
  0x22   :  { %426 = vperm.xlu0 %563, %v423_v55  }
  0x28   :  { %537 = vmatpush3.bf16.xpose.msra.mxu0 %v177_v51 }
  0x29   :  { %557 = vmatprep.subr.msk.bf16.mxu0 %vm154_vm0, %v72_v52 }
  0x30   :  { %539 = vmatpush3.bf16.xpose.msra.mxu0 %v174_v59 }
  0x31   :  { %558 = vmatprep.subr.msk.bf16.mxu0 %vm154_vm0, %v71_v60 }
  0x38   :  { %541 = vmatpush3.bf16.xpose.msra.mxu0 %v171_v2 }
  0x39   :  { %559 = vmatprep.subr.msk.bf16.mxu0 %vm154_vm0, %v70_v3 }
  0x40   :  { %543 = vmatpush3.bf16.xpose.msra.mxu0 %v168_v7 }
  0x47   :  { %545 = vmatmul.mubr.msk.bf16.vlgmr.msra.gmra.mxu0 %vm154_vm0, %v685_v21 }
  0x48   :  { %546 = vmatprep.mubr.msk.bf16.mxu0 %vm154_vm0, %v566_v9 }
  0x4f   :  { %547 = vmatmul.mubr.msk.bf16.gmra.mxu0 %vm154_vm0, %v566_v9 }
  0x50   :  { %548 = vmatprep.mubr.msk.bf16.mxu0 %vm154_vm0, %v567_v10 }
  0x57   :  { %549 = vmatmul.mubr.msk.bf16.gmra.mxu0 %vm154_vm0, %v567_v10 }
  0x58   :  { %550 = vmatprep.mubr.msk.bf16.mxu0 %vm154_vm0, %v568_v11 }
  0x5f   :  { %551 = vmatmul.mubr.msk.bf16.gmra.mxu0 %vm154_vm0, %v568_v11 }
  0x83   :  { %v127_v23 = vpop.permute.xlu0 %126 }
  0x84   :  { %v117_v21 = vpop.permute.xlu1 %116 }
  0x87   :  { %v132_v28 = vpop.permute.xlu0 %131 }
  0x88   :  { %v122_v26 = vpop.permute.xlu1 %121 }
  0x8d   :  { %v107_v39 = vpop.permute.xlu0 %106 }
  0x8e   :  { %v112_v34 = vpop.permute.xlu1 %111 }
  0x91   :  { %v97_v58 = vpop.permute.xlu0 %96 }
  0x92   :  { %v102_v51 = vpop.permute.xlu1 %101 }
 0x107   :  { %v249_v12 = vpop.f32.mrf.mxu0 }
 0x108   :  { %v250_v4 = vadd.f32 %v249_v12, %v97_v58  ;;  %v570_v12 = vld [vmem:[%s831_s3 + $0x8] sm:$0xff]  }
 0x109   :  { %v251_v13 = vpop.f32.mrf.mxu0 }
 0x10a   :  { %v252_v61 = vadd.f32 %v251_v13, %v97_v58  ;;  %v288_v11 = vmax.f32 %v250_v4, 0.0  ;;  %v569_v13 = vld [vmem:[%s831_s3] sm:$0xff]  }
 0x10b   :  { %v253_v14 = vpop.f32.mrf.mxu0 }
 0x10c   :  { %v254_v63 = vadd.f32 %v253_v14, %v102_v51  ;;  %v289_v6 = vmax.f32 %v252_v61, 0.0 }
 0x10d   :  { %v255_v15 = vpop.f32.mrf.mxu0 }
 0x10e   :  { %v256_v55 = vadd.f32 %v255_v15, %v102_v51  ;;  %v290_v7 = vmax.f32 %v254_v63, 0.0 }
 0x10f   :  { %v259_v16 = vpop.f32.mrf.mxu0 }
 0x110   :  { %v260_v59 = vadd.f32 %v259_v16, %v107_v39  ;;  %v291_v2 = vmax.f32 %v256_v55, 0.0  ;;  %v304_v15 = vpack.c.bf16 %v290_v7, %v288_v11 }
 0x111   :  { %v261_v17 = vpop.f32.mrf.mxu0 }
 0x112   :  { %v262_v48 = vadd.f32 %v261_v17, %v107_v39  ;;  %v292_v5 = vmax.f32 %v260_v59, 0.0  ;;  %v305_v10 = vpack.c.bf16 %v291_v2, %v289_v6 }
 0x113   :  { %v263_v18 = vpop.f32.mrf.mxu0 }
 0x114   :  { %v264_v52 = vadd.f32 %v263_v18, %v112_v34  ;;  %v293_v62 = vmax.f32 %v262_v48, 0.0  ;;  %v338_v18 = vpop.permute.xlu1 %337 }
 0x115   :  { %v265_v19 = vpop.f32.mrf.mxu0 }
 0x116   :  { %v266_v42 = vadd.f32 %v265_v19, %v112_v34  ;;  %v294_v0 = vmax.f32 %v264_v52, 0.0 }
 0x117   :  { %v269_v20 = vpop.f32.mrf.mxu0 }
 0x118   :  { %v270_v46 = vadd.f32 %v269_v20, %v117_v21  ;;  %v295_v56 = vmax.f32 %v266_v42, 0.0  ;;  %v306_v9 = vpack.c.bf16 %v294_v0, %v292_v5  ;;  %v333_v20 = vpop.permute.xlu0 %332 }
 0x119   :  { %v271_v22 = vpop.f32.mrf.mxu0 }
 0x11a   :  { %v272_v37 = vadd.f32 %v271_v22, %v117_v21  ;;  %v296_v60 = vmax.f32 %v270_v46, 0.0  ;;  %v307_v3 = vpack.c.bf16 %v295_v56, %v293_v62  ;;  %v422_v46 = vld [vmem:[%s833_s5] sm:$0x1]  ;;  %s507_s5 = sshll.u32 %s595_s26, 4  ;;  %s508_s5 = int_to_ptr.vmem [resolvable:$true] %s507_s5 }
 0x11b   :  { %v273_v24 = vpop.f32.mrf.mxu0  ;;  %s571_s27 = scalar_lea.vmem %s508_s5, 32  ;;  %p576_p1 = scmp.lt.s32.totalorder %s508_s5, %s508_s5 }
 0x11c   :  { %v274_v40 = vadd.f32 %v273_v24, %v122_v26  ;;  %v297_v49 = vmax.f32 %v272_v37, 0.0  ;;  %p572_p0 = scmp.ne.s32.totalorder %s508_s5, %s571_s27  ;;  %p577_p2 = scmp.lt.s32.totalorder %s571_s27, %s571_s27 }
 0x11d   :  { %v275_v25 = vpop.f32.mrf.mxu0 }
 0x11e   :  { %v276_v31 = vadd.f32 %v275_v25, %v122_v26  ;;  %v298_v53 = vmax.f32 %v274_v40, 0.0  ;;  %p578_p3 = por %p577_p2, %p576_p1 }
 0x11f   :  { %v279_v27 = vpop.f32.mrf.mxu0 }
 0x120   :  { %v280_v35 = vadd.f32 %v279_v27, %v127_v23  ;;  %v299_v43 = vmax.f32 %v276_v31, 0.0  ;;  %v308_v1 = vpack.c.bf16 %v298_v53, %v296_v60  ;;  %p579_p4 = pnand %p578_p3, %p572_p0 }
 0x121   :  { %v281_v29 = vpop.f32.mrf.mxu0 }
 0x122   :  { %v282_v32 = vadd.f32 %v281_v29, %v127_v23  ;;  %v300_v47 = vmax.f32 %v280_v35, 0.0  ;;  %v309_v57 = vpack.c.bf16 %v299_v43, %v297_v49  ;;  %v328_v23 = vpop.permute.xlu1 %327  ;;  %v594_v49 = vmov 1966171168  }
 0x123   :  { %v283_v30 = vpop.f32.mrf.mxu0 }
 0x124   :  { %v284_v33 = vadd.f32 %v283_v30, %v132_v28  ;;  %v301_v44 = vmax.f32 %v282_v32, 0.0 }
 0x125   :  { %v285_v36 = vpop.f32.mrf.mxu0 }
 0x126   :  { %v286_v38 = vadd.f32 %v285_v36, %v132_v28  ;;  %v302_v41 = vmax.f32 %v284_v33, 0.0  ;;  %v323_v28 = vpop.permute.xlu0 %322 }
 0x128   :  { %v303_v45 = vmax.f32 %v286_v38, 0.0  ;;  %v310_v54 = vpack.c.bf16 %v302_v41, %v300_v47  ;;  %v429_v47 = vlaneseq }
 0x12a   :  { %v311_v50 = vpack.c.bf16 %v303_v45, %v301_v44  ;;  %v430_v48 = vshrl.u32 %v429_v47, 7  ;;  %v427_v52 = vpop.permute.xlu0 %426  ;;  %vm498_vm3 = vcmp.lt.s32.totalorder %v429_v47, 256 }
 0x12c   :  { %365 = vmatprep.subr.bf16.mxu1 %v311_v50  ;;  %v482_v50 = vunpack.c.l.s4 %v594_v49  ;;  %v431_v51 = vsub.s32 0, %v430_v48 }
 0x12d   :  { %366 = vmatpush1.bf16.msra.mxu1 %v310_v54 }
 0x12e   :  { %367 = vmatprep.subr.bf16.mxu1 %v309_v57  ;;  %v483_v53 = vunpack.c.0.s8 %v482_v50  ;;  %v432_v55 = vrot.slane %v427_v52, %v431_v51 }
 0x130   :  { %v486_v59 = vsub.s32 %v483_v53, %v430_v48 }
 0x131   :  { %368 = vmatpush1.bf16.msra.mxu1 %v308_v1 }
 0x132   :  { %369 = vmatprep.subr.bf16.mxu1 %v307_v3 }
 0x135   :  { %370 = vmatpush1.bf16.msra.mxu1 %v306_v9 }
 0x136   :  { %371 = vmatprep.subr.bf16.mxu1 %v305_v10 }
 0x139   :  { %372 = vmatpush1.bf16.msra.mxu1 %v304_v15 }
 0x13c   :  { %525 = vmatmul.mubr.msk.bf16.vlgmr.msra.gmra.mxu1 %vm350_vm1, %v569_v13 }
 0x13d   :  { %399 = vmatprep.mubr.bf16.mxu1 %v593_v8 }
 0x144   :  { %526 = vmatmul.mubr.msk.bf16.gmra.mxu1 %vm350_vm1, %v570_v12 }
 0x145   :  { %469 = vmatprep.mubr.bf16.mxu1 %v593_v8 }
 0x1fc   :  { %v391_v14 = vpop.f32.mrf.mxu1 }
 0x1fd   :  { %v392_v37 = vadd.f32 %v391_v14, %v323_v28 }
 0x1fe   :  { %v393_v16 = vpop.f32.mrf.mxu1 }
 0x1ff   :  { %v394_v31 = vadd.f32 %v393_v16, %v323_v28  ;;  %v410_v44 = vmax.f32 %v392_v37, 0.0 }
 0x200   :  { %v395_v17 = vpop.f32.mrf.mxu1 }
 0x201   :  { %v396_v33 = vadd.f32 %v395_v17, %v328_v23  ;;  %v411_v39 = vmax.f32 %v394_v31, 0.0 }
 0x202   :  { %v397_v19 = vpop.f32.mrf.mxu1 }
 0x203   :  { %v398_v25 = vadd.f32 %v397_v19, %v328_v23  ;;  %v412_v41 = vmax.f32 %v396_v33, 0.0 }
 0x204   :  { %v401_v21 = vpop.f32.mrf.mxu1 }
 0x205   :  { %v402_v29 = vadd.f32 %v401_v21, %v333_v20  ;;  %v413_v34 = vmax.f32 %v398_v25, 0.0  ;;  %v418_v45 = vpack.c.bf16 %v412_v41, %v410_v44 }
 0x206   :  { %v403_v22 = vpop.f32.mrf.mxu1 }
 0x207   :  { %v404_v26 = vadd.f32 %v403_v22, %v333_v20  ;;  %v414_v38 = vmax.f32 %v402_v29, 0.0  ;;  %v419_v43 = vpack.c.bf16 %v413_v34, %v411_v39 }
 0x208   :  { %v405_v24 = vpop.f32.mrf.mxu1 }
 0x209   :  { %v406_v27 = vadd.f32 %v405_v24, %v338_v18  ;;  %v415_v35 = vmax.f32 %v404_v26, 0.0 }
 0x20a   :  { %v407_v30 = vpop.f32.mrf.mxu1 }
 0x20b   :  { %v408_v32 = vadd.f32 %v407_v30, %v338_v18  ;;  %v416_v8 = vmax.f32 %v406_v27, 0.0 }
 0x20d   :  { %v417_v36 = vmax.f32 %v408_v32, 0.0  ;;  %v420_v42 = vpack.c.bf16 %v416_v8, %v414_v38 }
 0x20f   :  { %v421_v40 = vpack.c.bf16 %v417_v36, %v415_v35 }
 0x211   :  { %449 = vmatprep.subr.bf16.mxu1 %v421_v40 }
 0x212   :  { %450 = vmatpush1.bf16.msra.mxu1 %v420_v42 }
 0x213   :  { %451 = vmatprep.subr.bf16.mxu1 %v419_v43 }
 0x216   :  { %452 = vmatpush1.bf16.msra.mxu1 %v418_v45 }
 0x219   :  { %527 = vmatmul.mubr.msk.bf16.vlgmr.msra.gmra.mxu1 %vm433_vm2, %v422_v46 }
 0x2d9   :  { %v471_v54 = vpop.f32.mrf.mxu1 }
 0x2da   :  { %v472_v57 = vadd.f32 %v471_v54, %v432_v55 }
 0x2db   :  { %v473_v56 = vpop.f32.mrf.mxu1 }
 0x2dc   :  { %v474_v58 = vadd.f32 %v473_v56, %v432_v55 }
 0x2dd   :  { %v475_v60 = vpop.f32.mrf.mxu1 }
 0x2de   :  { %v480_v61 = vcombine.low %v472_v57, %v474_v58 }
 0x2df   :  { %v476_v62 = vpop.f32.mrf.mxu1 }
 0x2e0   :  { %v487_v63 = vrot.slane %v480_v61, %v486_v59 }
 0x2e2   :  { %v494_v0 = vrot.slane %v487_v63, %v486_v59 }
 0x2e4   :  { %500 = vst.msk [vmem:[#allocation3] sm:$0x3] %vm498_vm3, %v494_v0 }
 0x2e5   :  { %582 = shalt.err (!%p579_p4)
}
 0x2e6   :  { %510 = dma.vmem_to_hbm [thread:$0]  %s508_s5, 32, %s835_s7, [#allocation4]  }
 0x2e7   :  { %591 = dma.done.wait [#allocation4], 32  }
 0x2e8   :  { %592 = vsyncadd [#allocation4], 4294967264 }
 0x2e9   :  { %514 = vsyncpa [#allocation4], 1 }

</bundles_post_ra>
